<compile_context>
chip_gen: v7x
topology: tpu7x:2x2x1
jax: 0.10.0
libtpu: 0.0.40
codegen_flags: <defaults>
</compile_context>

<pallas_src>
import math

import jax
import jax.numpy as jnp
from jax.experimental import pallas as pl
from jax.experimental.pallas import tpu as pltpu


# ----------------------------------------------------------------------------- 
# Kernel body
# -----------------------------------------------------------------------------
def _layer_scale_kernel(x_ref, gamma_ref, o_ref):
    # x_ref:     (row_tile, lane_tile)  VMEM tile of the flattened input
    # gamma_ref: (1, lane_tile)         gamma row, already float32
    # o_ref:     (row_tile, lane_tile)
    #
    # Multiply in f32 so bf16 activations don't force gamma (~1e-5) through a
    # bf16 round-trip before the product; cast the product back to x.dtype.
    x = x_ref[...].astype(jnp.float32)
    o_ref[...] = (x * gamma_ref[...]).astype(o_ref.dtype)


# -----------------------------------------------------------------------------
# Tiling policy
# -----------------------------------------------------------------------------
def _sublane_pack(dtype) -> int:
    # Full-width sublane packing: 8 rows for 32-bit, 16 for 16-bit, 32 for 8-bit.
    itemsize = jnp.dtype(dtype).itemsize
    return max(8, 32 // itemsize)


_MIN_GRID_STEPS = 8     # want at least this many steps for pipelining / 2-TC
_LANE_TILE = 1024       # lane-axis block (8 vregs wide) when splitting lanes
_FALLBACK_BUDGET = 12 * 1024 * 1024


def _vmem_budget_bytes():
    """Returns (byte budget for the x/out tile set, explicit vmem limit or None).

    The budget covers the double-buffered input + output tiles (4 resident
    tiles by default). Generation-aware so v6e/v5e (128 MiB physical) get
    larger tiles, while v7x (64 MiB physical) stays under its default scoped
    limit with ample headroom.
    """
    try:
        phys = int(pltpu.get_tpu_info().vmem_capacity_bytes)
    except Exception:
        # Unknown chip / interpret mode: fits every default scoped limit.
        return _FALLBACK_BUDGET, None
    if phys >= 96 * 1024 * 1024:
        # v5e / v6e (128 MiB physical). Raise the scoped limit explicitly so
        # v5e's 16 MiB default does not bind; 40 MiB is far below physical.
        return 24 * 1024 * 1024, 40 * 1024 * 1024
    # v7x: 64 MiB physical, 32 MiB default scoped limit.
    return 20 * 1024 * 1024, None


# -----------------------------------------------------------------------------
# Wrapper
# -----------------------------------------------------------------------------
def layer_scale(x, gamma, *, row_tile=None, buffer_depth=None, donate_x=False):
    """LayerScale forward: x * gamma, gamma broadcast over the last axis.

    x: (..., dim), gamma: (dim,). Returns an array with x's shape and dtype.
    If donate_x=True, the output aliases the (flattened) input buffer (the
    caller must actually donate x, e.g. via jit donate_argnums; x must be
    contiguous row-major or the reshape inserts a hidden copy).
    """
    orig_shape = x.shape
    dim = orig_shape[-1]
    assert gamma.shape == (dim,), (gamma.shape, dim)

    # Flatten leading dims into rows.
    x2 = x.reshape(-1, dim)
    n_rows = x2.shape[0]

    # ---- Lane-dense fold ----------------------------------------------------
    # If dim is not a multiple of 128 (lane width), fold k consecutive rows into
    # the lane axis (pure row-major reshape) and tile gamma k times, so the
    # kernel's last dim is a multiple of 128 -> full-width vst, never masked
    # vst.msk. If n_rows is not a multiple of k, pad with <= k-1 (<= 127) zero
    # rows and slice them off afterwards (negligible vs. losing lane-dense
    # stores on the whole array).
    k = 1
    pad_rows = 0
    if dim % 128 != 0:
        k = 128 // math.gcd(dim, 128)          # k >= 2 here
        pad_rows = (-n_rows) % k
        if pad_rows:
            x2 = jnp.pad(x2, ((0, pad_rows), (0, 0)))
    dim_eff = dim * k
    n_rows_eff = (n_rows + pad_rows) // k
    x2 = x2.reshape(n_rows_eff, dim_eff)

    # gamma: tiled for the fold and cast to f32 ONCE here, so the kernel body
    # has no per-step cast.
    gamma_eff = jnp.tile(gamma, k) if k > 1 else gamma
    gamma_eff = gamma_eff.astype(jnp.float32).reshape(1, dim_eff)

    # ---- Byte-based tile selection -------------------------------------------
    itemsize = jnp.dtype(x.dtype).itemsize
    pack = _sublane_pack(x.dtype)
    budget, vmem_limit = _vmem_budget_bytes()
    depth = 2 if buffer_depth is None else int(buffer_depth)
    # Per-tile byte target: `depth` buffers each for input and output.
    tile_target = max(256 * 1024, budget // (2 * depth))

    rows_padded = pl.cdiv(n_rows_eff, pack) * pack

    def _rows_for(lane_tile_):
        bytes_per_row = lane_tile_ * itemsize
        r = max(pack, (tile_target // bytes_per_row) // pack * pack)
        return min(r, max(pack, rows_padded))

    lane_tile = dim_eff
    if row_tile is None:
        row_tile = _rows_for(lane_tile)
        # Wide-dim / few-row inputs: also split the lane axis so there are
        # enough grid steps for software pipelining and multi-core sharding.
        if (pl.cdiv(n_rows_eff, row_tile) < _MIN_GRID_STEPS
                and dim_eff >= 2 * _LANE_TILE):
            lane_tile = _LANE_TILE
            row_tile = _rows_for(lane_tile)
    else:
        row_tile = max(pack, (int(row_tile) // pack) * pack)
        row_tile = min(row_tile, max(pack, rows_padded))

    grid = (pl.cdiv(n_rows_eff, row_tile), pl.cdiv(dim_eff, lane_tile))

    def _xo_spec():
        # Optional deeper pipelining (sweep on v7x when steps are short).
        if buffer_depth is None:
            return pl.BlockSpec((row_tile, lane_tile), lambda i, j: (i, j))
        return pl.BlockSpec((row_tile, lane_tile), lambda i, j: (i, j),
                            pipeline_mode=pl.Buffered(int(buffer_depth)))

    compiler_kwargs = dict(
        # Both grid axes write disjoint output blocks -> fully parallel; lets
        # the row/lane grid shard across v7x's two TensorCores (megacore).
        dimension_semantics=("parallel", "parallel"),
    )
    if vmem_limit is not None:
        compiler_kwargs["vmem_limit_bytes"] = vmem_limit

    out = pl.pallas_call(
        _layer_scale_kernel,
        out_shape=jax.ShapeDtypeStruct((n_rows_eff, dim_eff), x.dtype),
        grid_spec=pltpu.PrefetchScalarGridSpec(
            num_scalar_prefetch=0,
            grid=grid,
            in_specs=[
                _xo_spec(),
                # gamma row: tiny, re-fetched per lane block only.
                pl.BlockSpec((1, lane_tile), lambda i, j: (0, j)),
            ],
            out_specs=_xo_spec(),
        ),
        compiler_params=pltpu.CompilerParams(**compiler_kwargs),
        # Optional in-place update over x (matches the module's inplace mode
        # when the caller donates x). Input index 0 is valid only while
        # num_scalar_prefetch == 0.
        input_output_aliases=({0: 0} if donate_x else {}),
    )(x2, gamma_eff)

    out = out.reshape(n_rows + pad_rows, dim)
    if pad_rows:
        out = out[:n_rows]
    return out.reshape(orig_shape)


if __name__ == "__main__":
    key = jax.random.PRNGKey(0)

    # Main case: matches the PyTorch module's (B, N, C) token layout.
    batch, seq, dim = 2, 8, 32
    init_values = 1e-5
    gamma = init_values * jnp.ones((dim,), dtype=jnp.float32)
    x = jax.random.normal(key, (batch, seq, dim), dtype=jnp.float32)

    y = jax.block_until_ready(layer_scale(x, gamma))
    y_ref = x * gamma
    assert y.shape == x.shape and y.dtype == x.dtype
    assert jnp.allclose(y, y_ref, rtol=1e-6, atol=1e-6)

    # bf16 activations (production dtype); gamma stays f32, product cast to bf16.
    xb = jax.random.normal(jax.random.PRNGKey(1), (batch, seq, 64), dtype=jnp.bfloat16)
    gb = init_values * jnp.ones((64,), dtype=jnp.float32)
    yb = jax.block_until_ready(layer_scale(xb, gb))
    yb_ref = (xb.astype(jnp.float32) * gb).astype(jnp.bfloat16)
    assert yb.shape == xb.shape and yb.dtype == jnp.bfloat16
    assert jnp.allclose(yb.astype(jnp.float32), yb_ref.astype(jnp.float32),
                        rtol=1e-2, atol=1e-8)

    # Ragged path: dim not a multiple of 128 and rows not divisible by the fold
    # factor -> rows padded up to the fold factor; stores stay lane-dense.
    xr = jax.random.normal(jax.random.PRNGKey(2), (7, 3, 48), dtype=jnp.float32)
    gr = init_values * jnp.ones((48,), dtype=jnp.float32)
    yr = jax.block_until_ready(layer_scale(xr, gr))
    assert jnp.allclose(yr, xr * gr, rtol=1e-6, atol=1e-6)

    # Wide-dim / few-row path: exercises the lane-axis grid split.
    xw = jax.random.normal(jax.random.PRNGKey(3), (16, 4096), dtype=jnp.float32)
    gw = init_values * jnp.ones((4096,), dtype=jnp.float32)
    yw = jax.block_until_ready(layer_scale(xw, gw))
    assert jnp.allclose(yw, xw * gw, rtol=1e-6, atol=1e-6)

    print("KERNEL_OK")
</pallas_src>

<mosaic_0001>
module attributes {stable_mosaic.version = 11 : i64} {
  func.func @_layer_scale_kernel(%arg0: i32, %arg1: i32, %arg2: memref<8x128xf32, #tpu.memory_space<vmem>>, %arg3: memref<1x128xf32, #tpu.memory_space<vmem>>, %arg4: memref<8x128xf32, #tpu.memory_space<vmem>>) attributes {dimension_semantics = [#tpu.dimension_semantics<parallel>, #tpu.dimension_semantics<parallel>], iteration_bounds = array<i64: 1, 1>, scalar_prefetch = 0 : i64, scratch_operands = 0 : i64, tpu.core_type = #tpu.core_type<tc>, window_params = [{transform_indices = @transform_0, window_bounds = array<i64: 8, 128>}, {transform_indices = @transform_1, window_bounds = array<i64: 1, 128>}, {transform_indices = @transform_2, window_bounds = array<i64: 8, 128>}]} {
    %c0 = arith.constant 0 : index
    %c0_0 = arith.constant 0 : index
    %0 = vector.load %arg2[%c0, %c0_0] : memref<8x128xf32, #tpu.memory_space<vmem>>, vector<8x128xf32>
    %c0_1 = arith.constant 0 : index
    %c0_2 = arith.constant 0 : index
    %1 = vector.load %arg3[%c0_1, %c0_2] : memref<1x128xf32, #tpu.memory_space<vmem>>, vector<1x128xf32>
    %2 = vector.broadcast %1 : vector<1x128xf32> to vector<8x128xf32>
    %3 = arith.mulf %0, %2 : vector<8x128xf32>
    %c0_3 = arith.constant 0 : index
    %c0_4 = arith.constant 0 : index
    %4 = vector.load %arg4[%c0_3, %c0_4] : memref<8x128xf32, #tpu.memory_space<vmem>>, vector<8x128xf32>
    tpu.vector_store %arg4[%c0_3, %c0_4], %3 {strides = array<i32>} : memref<8x128xf32, #tpu.memory_space<vmem>>, vector<8x128xf32>,
    return
  }
  func.func @transform_0(%arg0: i32, %arg1: i32) -> (i32, i32) {
    %c0_i32 = arith.constant 0 : i32
    return %arg0, %arg1 : i32, i32
  }
  func.func @transform_1(%arg0: i32, %arg1: i32) -> (i32, i32) {
    %c0_i32 = arith.constant 0 : i32
    %c0_i32_0 = arith.constant 0 : i32
    return %c0_i32, %arg1 : i32, i32
  }
  func.func @transform_2(%arg0: i32, %arg1: i32) -> (i32, i32) {
    %c0_i32 = arith.constant 0 : i32
    return %arg0, %arg1 : i32, i32
  }
}

</mosaic_0001>

<bundles_post_ra>
// kernel: tpu_custom_call.1
= control target key start
LH: loop header
LB: loop body
LE: loop exit
PB: predicated region body
PF: predicated region fallthrough
CT: control target
= control target key end

     0   :  { %7 = vsyncpa [#allocation3], 0  ;;  %s152_s0 = inlined_call_operand.hbm [shape: f32[4,128], index: 0, kind: input, shape index: {}]   ;;  %s153_s1 = inlined_call_operand.vmem [shape: f32[1,128], index: 1, kind: input, shape index: {}]   ;;  %s154_s2 = inlined_call_operand.hbm [shape: f32[4,128], index: 2, kind: output, shape index: {}]  }
   0x1   :  { %8 = vsyncpa [#allocation4], 0 }
   0x2   :  { %13 = vsyncadd [#allocation3], 64  ;;  %s106_s9 = smov [#allocation2]   ;;  %s58_s13 = scalar_lea.hbm %s152_s0, 64 }
   0x3   :  { %s14_s10 = sshll.u32 %s106_s9, 4  ;;  %p59_p0 = scmp.ne.s32.totalorder %s152_s0, %s58_s13  ;;  %s15_s10 = int_to_ptr.vmem [resolvable:$true] %s14_s10 }
   0x4   :  { %p62_p1 = scmp.lt.u32.totalorder %s58_s13, %s152_s0 }
   0x6   :  { %p64_p2 = pnand %p62_p1, %p59_p0 }
   0x8   :  { %67 = shalt.err (!%p64_p2)
}
   0x9   :  { %s68_s18 = scalar_lea.vmem %s15_s10, 64  ;;  %s72_s19 = scalar_lea.vmem %s15_s10, 128 }
   0xa   :  { %p69_p3 = scmp.ne.s32.totalorder %s15_s10, %s68_s18  ;;  %p73_p4 = scmp.lt.s32.totalorder %s15_s10, %s15_s10 }
   0xb   :  { %p74_p5 = scmp.lt.s32.totalorder %s72_s19, %s68_s18 }
   0xd   :  { %p75_p6 = por %p74_p5, %p73_p4 }
   0xf   :  { %p76_p7 = pnand %p75_p6, %p69_p3 }
  0x11   :  { %79 = shalt.err (!%p76_p7)
}
  0x12   :  { %s107_s20 = smov 64   ;;  %s108_s21 = smov 4  }
  0x13   :  { %20 = dma.hbm_to_vmem [thread:$0]  %s152_s0, 64, %s15_s10, [#allocation3], %s107_s20, %s107_s20, %s108_s21  }
  0x14   :  { %102 = dma.done.wait [#allocation3], 128  }
  0x15   :  { %103 = vsyncadd [#allocation3], 4294967168  ;;  %v26_v0 = vld [vmem:[#allocation2] sm:$0xff] }
  0x16   :  { %v53_v1 = vld [vmem:[%s153_s1] ss:$0 sm:$0xff] }
  0x17   :  { %v34_v2 = vmul.f32 %v53_v1, %v26_v0 }
  0x19   :  { %35 = vst [vmem:[#allocation5] sm:$0xff] %v34_v2 }
  0x1a   :  { %40 = vsyncadd [#allocation4], 64  ;;  %s109_s26 = smov [#allocation5]  }
  0x1b   :  { %s41_s27 = sshll.u32 %s109_s26, 4  ;;  %s42_s27 = int_to_ptr.vmem [resolvable:$true] %s41_s27 }
  0x1c   :  { %s80_s28 = scalar_lea.vmem %s42_s27, 64  ;;  %s84_s29 = scalar_lea.vmem %s42_s27, 128 }
  0x1d   :  { %p81_p8 = scmp.ne.s32.totalorder %s42_s27, %s80_s28  ;;  %p85_p9 = scmp.lt.s32.totalorder %s42_s27, %s42_s27 }
  0x1e   :  { %p86_p10 = scmp.lt.s32.totalorder %s84_s29, %s80_s28 }
  0x20   :  { %p87_p11 = por %p86_p10, %p85_p9 }
  0x22   :  { %p88_p12 = pnand %p87_p11, %p81_p8 }
  0x24   :  { %91 = shalt.err (!%p88_p12)
}
  0x25   :  { %s92_s3 = scalar_lea.hbm %s154_s2, 64 }
  0x26   :  { %p93_p13 = scmp.ne.s32.totalorder %s154_s2, %s92_s3  ;;  %p96_p0 = scmp.lt.u32.totalorder %s92_s3, %s154_s2 }
  0x28   :  { %p98_p1 = pnand %p96_p0, %p93_p13 }
  0x2a   :  { %101 = shalt.err (!%p98_p1)
}
  0x2b   :  { %47 = dma.vmem_to_hbm [thread:$0]  %s42_s27, 64, %s154_s2, [#allocation4], %s107_s20, %s107_s20, %s108_s21  }
  0x2c   :  { %104 = dma.done.wait [#allocation4], 128  }
  0x2d   :  { %105 = vsyncadd [#allocation4], 4294967168 }
  0x2e   :  { %51 = vsyncpa [#allocation3], 1 }
  0x2f   :  { %52 = vsyncpa [#allocation4], 1 }

</bundles_post_ra>
